<compile_context>
chip_gen: v6e
topology: v6e:2x2x1
jax: 0.10.0
libtpu: 0.0.40
codegen_flags: <defaults>
</compile_context>

<pallas_src>
import jax
import jax.numpy as jnp
from jax import lax
from jax.experimental import pallas as pl
from jax.experimental.pallas import tpu as pltpu


_VMEM_LIMIT_BYTES = 32 * 1024 * 1024   # scoped VMEM limit (safe on v5e/v6e/v7x)
_TILE_BUDGET_BYTES = 20 * 1024 * 1024  # working-set budget used to size the row tile
_CHUNK = 256                           # rows per fused inner-loop step
_MAX_BLOCK_ROWS = 4096                 # cap on grouped rows per grid step
# TODO(synk): derive budgets from pltpu.get_tpu_info() (64 MiB VMEM/TC on v7x).


def _round_up(x, m):
    return ((x + m - 1) // m) * m


def _choose_fold(n_rows, n_classes):
    """k rows folded into lanes (W = k*C <= 128). Prefer a near-max k dividing N
    (no wrapper-side slice); otherwise keep the max fold and push the <k-row
    remainder to plain JAX in the wrapper. Lane density stays >= ~80%."""
    kmax = max(1, min(128 // n_classes, n_rows))
    min_k = max(1, kmax - kmax // 5)
    for cand in range(kmax, min_k - 1, -1):
        if n_rows % cand == 0:
            return cand
    return kmax


def _choose_block_rows(w, pred_itemsize):
    """Largest multiple-of-_CHUNK grouped-row tile inside the VMEM budget."""
    lane_w = _round_up(w, 128)
    # double-buffered pred block + double-buffered bf16 target block (lane-padded)
    per_row = lane_w * 2 * pred_itemsize + 128 * 2 * 2
    # fused chunk temporaries (t_rep/mask/pred/select/count) are bounded by _CHUNK rows
    temps = 6 * _CHUNK * lane_w * 4
    rows = max(_CHUNK, (_TILE_BUDGET_BYTES - temps) // per_row)
    rows = min(rows, _MAX_BLOCK_ROWS)
    return max(_CHUNK, (rows // _CHUNK) * _CHUNK)


def _make_kernel(has_weight, n_chunks, chunk):
    def kernel(pred_ref, tgt_ref, e_ref, cls_ref, *rest):
        if has_weight:
            wl_ref, num_ref, den_ref, acc_s, acc_c = rest
        else:
            num_ref, acc_s = rest
            wl_ref = den_ref = acc_c = None

        i = pl.program_id(1)
        k, w = e_ref.shape

        @pl.when(i == 0)
        def _init():
            acc_s[...] = jnp.zeros_like(acc_s)
            if has_weight:
                acc_c[...] = jnp.zeros_like(acc_c)

        cls = cls_ref[...]      # (1, W) f32: class id of each folded lane (l % C)
        e = e_ref[...]          # (k, W) bf16 0/1: lane l belongs to folded row l // C

        def chunk_body(c, carry):
            r0 = pl.multiple_of(c * chunk, chunk)
            tg = tgt_ref[pl.ds(r0, chunk), :]                    # (chunk, k) bf16
            if k == 1:
                t_rep = tg.astype(jnp.float32)                   # broadcasts vs (1, W)
            else:
                # Exact on the MXU: each output is a single 0/1 * small-int product.
                t_rep = jnp.dot(tg, e, preferred_element_type=jnp.float32)
            mask = t_rep == cls                                  # exact integer compare
            # Select on *raw* pred: garbage/NaN rows of partial/clamped blocks
            # never enter arithmetic (their padded target is -1 -> mask False).
            p = pred_ref[pl.ds(r0, chunk), :].astype(jnp.float32)
            sel = jnp.where(mask, p, 0.0)
            s = carry[0] + jnp.sum(sel, axis=0, keepdims=True)
            if has_weight:
                cnt = carry[1] + jnp.sum(jnp.where(mask, 1.0, 0.0),
                                         axis=0, keepdims=True)
                return (s, cnt)
            return (s,)

        zero = jnp.zeros((1, w), jnp.float32)
        init = (zero, zero) if has_weight else (zero,)
        part = lax.fori_loop(0, n_chunks, chunk_body, init, unroll=True)
        acc_s[...] += part[0]
        if has_weight:
            acc_c[...] += part[1]

        @pl.when(i == pl.num_programs(1) - 1)
        def _finalize():
            if has_weight:
                # Class weights and the minus sign are applied once on the
                # (1, W) accumulators, not per element in the hot loop.
                wl = wl_ref[...]                                 # (1, W): w[l % C]
                num = -jnp.sum(acc_s[...] * wl)
                den = jnp.sum(acc_c[...] * wl)
                num_ref[...] = jnp.broadcast_to(num, num_ref.shape)
                den_ref[...] = jnp.broadcast_to(den, den_ref.shape)
            else:
                num_ref[...] = jnp.broadcast_to(-jnp.sum(acc_s[...]), num_ref.shape)

    return kernel


def unmasked_weighted_nll_loss(pred, target, weight=None, *, block_rows=None):
    """Forward pass of UnMaskedWeightedNLLLoss.

    pred:   (N, C) log-probabilities (float32 or bfloat16)
    target: (N,)   int class indices
    weight: optional (C,) class weights
    """
    N, C = pred.shape
    has_weight = weight is not None
    w_f32 = jnp.asarray(weight, jnp.float32) if has_weight else None

    # ---- lane folding: k consecutive rows share one vreg row (W = k*C lanes) ----
    k = _choose_fold(N, C)
    W = k * C
    Ng = N // k
    N_main = Ng * k
    N_rem = N - N_main                      # < k rows, finished in plain JAX below

    pred_main = pred if N_rem == 0 else pred[:N_main]
    pred2 = pred_main.reshape(Ng, W)        # free row-major reshape; no pad, no cast

    # ---- grid geometry: big VMEM-budgeted row tiles, fused _CHUNK-row inner loop ----
    rows_needed = _round_up(Ng, 8)
    if block_rows is not None:
        limit = max(8, (int(block_rows) // 8) * 8)
    else:
        limit = _choose_block_rows(W, jnp.dtype(pred.dtype).itemsize)
    if rows_needed <= limit:
        chunk = min(_CHUNK, rows_needed)
        tm = _round_up(rows_needed, chunk)
    else:
        chunk = min(_CHUNK, limit)
        tm = (limit // chunk) * chunk
    n_chunks = tm // chunk

    nb = pl.cdiv(Ng, tm)                    # real row blocks
    n_split = 2 if nb >= 2 else 1           # leading "parallel" axis (v7x megacore)
    nb_pad = _round_up(nb, n_split)         # never lose the split to an odd nb
    bps = nb_pad // n_split
    last_block = nb - 1

    # ---- targets: bf16 (exact for class ids < 256), padded with -1 so padded
    # rows / garbage pred rows of partial or clamped blocks never match a class ----
    tgt_dtype = jnp.bfloat16 if C <= 256 else jnp.float32
    tgt = (target[:N_main] if N_rem else target).astype(tgt_dtype)
    total_rows = nb_pad * tm * k
    if total_rows > N_main:
        tgt = jnp.pad(tgt, (0, total_rows - N_main), constant_values=-1)
    tgt2 = tgt.reshape(nb_pad * tm, k)

    # ---- small constants describing the folded lane layout ----
    lane = jnp.arange(W, dtype=jnp.int32)
    expand = (lane[None, :] // C
              == jnp.arange(k, dtype=jnp.int32)[:, None]).astype(jnp.bfloat16)  # (k, W)
    cls_pattern = (lane % C).astype(jnp.float32).reshape(1, W)                   # (1, W)

    in_arrays = [pred2, tgt2, expand, cls_pattern]
    in_specs = [
        # padded blocks (from nb -> nb_pad) clamp to the last real block; their
        # targets are all -1 so they contribute nothing.
        pl.BlockSpec((tm, W),
                     lambda p, i: (jnp.minimum(p * bps + i, last_block), 0)),
        pl.BlockSpec((tm, k), lambda p, i: (p * bps + i, 0)),
        pl.BlockSpec((k, W), lambda p, i: (0, 0)),
        pl.BlockSpec((1, W), lambda p, i: (0, 0)),
    ]
    if has_weight:
        in_arrays.append(jnp.tile(w_f32, k).reshape(1, W))        # wl[l] = w[l % C]
        in_specs.append(pl.BlockSpec((1, W), lambda p, i: (0, 0)))

    part_shape = jax.ShapeDtypeStruct((n_split, 8, 128), jnp.float32)
    part_spec = pl.BlockSpec((1, 8, 128), lambda p, i: (p, 0, 0))
    if has_weight:
        out_shape = (part_shape, part_shape)
        out_specs = [part_spec, part_spec]
        scratch = [pltpu.VMEM((1, W), jnp.float32), pltpu.VMEM((1, W), jnp.float32)]
    else:
        out_shape = (part_shape,)
        out_specs = [part_spec]
        scratch = [pltpu.VMEM((1, W), jnp.float32)]

    outs = pl.pallas_call(
        _make_kernel(has_weight, n_chunks, chunk),
        out_shape=out_shape,
        grid_spec=pltpu.PrefetchScalarGridSpec(
            num_scalar_prefetch=0,
            grid=(n_split, bps),
            in_specs=in_specs,
            out_specs=out_specs,
            scratch_shapes=scratch,
        ),
        compiler_params=pltpu.CompilerParams(
            dimension_semantics=("parallel", "arbitrary"),
            vmem_limit_bytes=_VMEM_LIMIT_BYTES,
        ),
    )(*in_arrays)

    # TODO(synk): for vocabulary-sized C, additionally tile the class dimension.
    num = jnp.sum(outs[0][:, 0, 0])
    den = jnp.sum(outs[1][:, 0, 0]) if has_weight else None

    # ---- <k-row remainder (N % k) finished in plain JAX: O(k*C) work, keeps the
    # kernel at the maximum lane fold for the bulk of N ----
    if N_rem:
        pr = pred[N_main:].astype(jnp.float32)
        tr = target[N_main:].astype(jnp.int32)
        sel = jnp.take_along_axis(pr, tr[:, None], axis=1)[:, 0]
        if has_weight:
            wr = w_f32[tr]
            num = num - jnp.sum(wr * sel)
            den = den + jnp.sum(wr)
        else:
            num = num - jnp.sum(sel)

    return num / den if has_weight else num


def _reference(pred, target, weight=None):
    """Pure-JAX reference for validation."""
    predf = pred.astype(jnp.float32)
    sel = jnp.take_along_axis(predf, target[:, None].astype(jnp.int32), axis=1)[:, 0]
    if weight is None:
        return -jnp.sum(sel)
    wt = jnp.asarray(weight, jnp.float32)[target]
    return -jnp.sum(wt * sel) / jnp.sum(wt)


if __name__ == "__main__":
    key = jax.random.PRNGKey(0)

    def check(N, C, dtype, with_weight, block_rows=None, tol=1e-5):
        k1, k2, k3 = jax.random.split(jax.random.fold_in(key, 131 * N + C), 3)
        logits = jax.random.normal(k1, (N, C), jnp.float32)
        pred = jax.nn.log_softmax(logits, axis=-1).astype(dtype)
        target = jax.random.randint(k2, (N,), 0, C, jnp.int32)
        weight = (jax.random.uniform(k3, (C,), jnp.float32, 0.5, 1.5)
                  if with_weight else None)
        got = unmasked_weighted_nll_loss(pred, target, weight,
                                         block_rows=block_rows)
        got = jax.block_until_ready(got)
        want = _reference(pred, target, weight)
        assert jnp.allclose(got, want, rtol=tol, atol=tol), (
            N, C, str(dtype), with_weight, float(got), float(want))

    # batch=2, seq_len=8, n_classes=7 (the module's typical MELD-sized usage)
    check(2 * 8, 7, jnp.float32, with_weight=False)
    check(2 * 8, 7, jnp.float32, with_weight=True)
    # N not divisible by the max fold: <k-row remainder finished in the wrapper
    check(148, 7, jnp.float32, with_weight=True)
    # multi-block grid exercising the 2-way "parallel" split
    check(256, 7, jnp.float32, with_weight=True, block_rows=8)
    # bf16 activations stay bf16 in HBM; upcast happens inside the kernel
    check(2 * 8, 7, jnp.bfloat16, with_weight=True, tol=2e-2)
    # large N: chunked fused inner loop, odd block count (padded + clamped block),
    # partial last block, and the 2-way megacore split
    check(150_000, 7, jnp.float32, with_weight=True, tol=1e-4)

    print("KERNEL_OK")
</pallas_src>

<mosaic_0001>
module attributes {stable_mosaic.version = 11 : i64} {
  func.func @kernel(%arg0: i32, %arg1: i32, %arg2: memref<8x112xf32, #tpu.memory_space<vmem>>, %arg3: memref<8x16xbf16, #tpu.memory_space<vmem>>, %arg4: memref<16x112xbf16, #tpu.memory_space<vmem>>, %arg5: memref<1x112xf32, #tpu.memory_space<vmem>>, %arg6: memref<1x8x128xf32, #tpu.memory_space<vmem>>, %arg7: memref<1x112xf32, #tpu.memory_space<vmem>>) attributes {dimension_semantics = [#tpu.dimension_semantics<parallel>, #tpu.dimension_semantics<arbitrary>], iteration_bounds = array<i64: 1, 1>, scalar_prefetch = 0 : i64, scratch_operands = 1 : i64, tpu.core_type = #tpu.core_type<tc>, window_params = [{transform_indices = @transform_0, window_bounds = array<i64: 8, 112>}, {transform_indices = @transform_1, window_bounds = array<i64: 8, 16>}, {pipeline_mode = #tpu.pipeline_mode<synchronous>, transform_indices = @transform_2, window_bounds = array<i64: 16, 112>}, {pipeline_mode = #tpu.pipeline_mode<synchronous>, transform_indices = @transform_3, window_bounds = array<i64: 1, 112>}, {transform_indices = @transform_4, window_bounds = array<i64: 1, 8, 128>}]} {
    %c0_i32 = arith.constant 0 : i32
    %0 = arith.cmpi eq, %arg1, %c0_i32 : i32
    %1 = arith.extui %0 : i1 to i32
    %c0_i32_0 = arith.constant 0 : i32
    %2 = arith.cmpi ne, %1, %c0_i32_0 : i32
    scf.if %2 {
      %cst_16 = arith.constant 0.000000e+00 : f32
      %26 = vector.broadcast %cst_16 : f32 to vector<1x112xf32>
      %c0_17 = arith.constant 0 : index
      %c0_18 = arith.constant 0 : index
      %27 = vector.load %arg7[%c0_17, %c0_18] : memref<1x112xf32, #tpu.memory_space<vmem>>, vector<1x112xf32>
      tpu.vector_store %arg7[%c0_17, %c0_18], %26 {strides = array<i32>} : memref<1x112xf32, #tpu.memory_space<vmem>>, vector<1x112xf32>,
    } else {
    }
    %c0 = arith.constant 0 : index
    %c0_1 = arith.constant 0 : index
    %3 = vector.load %arg5[%c0, %c0_1] : memref<1x112xf32, #tpu.memory_space<vmem>>, vector<1x112xf32>
    %c0_2 = arith.constant 0 : index
    %c0_3 = arith.constant 0 : index
    %4 = vector.load %arg4[%c0_2, %c0_3] : memref<16x112xbf16, #tpu.memory_space<vmem>>, vector<16x112xbf16>
    %cst = arith.constant 0.000000e+00 : f32
    %5 = vector.broadcast %cst : f32 to vector<1x112xf32>
    %c0_i32_4 = arith.constant 0 : i32
    %c8_i32 = arith.constant 8 : i32
    %6 = arith.muli %c0_i32_4, %c8_i32 : i32
    %7 = tpu.assume_multiple %6, 8 : i32
    %8 = arith.index_cast %7 : i32 to index
    %c0_5 = arith.constant 0 : index
    %9 = vector.load %arg3[%8, %c0_5] : memref<8x16xbf16, #tpu.memory_space<vmem>>, vector<8x16xbf16>
    %cst_6 = arith.constant dense<0.000000e+00> : vector<8x112xf32>
    %10 = tpu.matmul %9, %4, %cst_6 {dimension_numbers = #tpu.dot_dimension_numbers<[1], [0], [0], [1], [0, 0, 1, 1], [], []>} : vector<8x16xbf16>, vector<16x112xbf16>, vector<8x112xf32> -> vector<8x112xf32>
    %11 = vector.broadcast %3 : vector<1x112xf32> to vector<8x112xf32>
    %12 = arith.cmpf oeq, %10, %11 : vector<8x112xf32>
    %13 = arith.index_cast %7 : i32 to index
    %c0_7 = arith.constant 0 : index
    %14 = vector.load %arg2[%13, %c0_7] : memref<8x112xf32, #tpu.memory_space<vmem>>, vector<8x112xf32>
    %cst_8 = arith.constant 0.000000e+00 : f32
    %15 = vector.broadcast %cst_8 : f32 to vector<8x112xf32>
    %16 = arith.select %12, %14, %15 : vector<8x112xi1>, vector<8x112xf32>
    %cst_9 = arith.constant dense<0.000000e+00> : vector<112xf32>
    %17 = vector.multi_reduction <add>, %16, %cst_9 [0] : vector<8x112xf32> to vector<112xf32>
    %18 = vector.shape_cast %17 : vector<112xf32> to vector<1x112xf32>
    %19 = arith.addf %5, %18 : vector<1x112xf32>
    %c1_i32 = arith.constant 1 : i32
    %c0_10 = arith.constant 0 : index
    %c0_11 = arith.constant 0 : index
    %20 = vector.load %arg7[%c0_10, %c0_11] : memref<1x112xf32, #tpu.memory_space<vmem>>, vector<1x112xf32>
    %21 = arith.addf %20, %19 : vector<1x112xf32>
    %c0_12 = arith.constant 0 : index
    %c0_13 = arith.constant 0 : index
    %22 = vector.load %arg7[%c0_12, %c0_13] : memref<1x112xf32, #tpu.memory_space<vmem>>, vector<1x112xf32>
    tpu.vector_store %arg7[%c0_12, %c0_13], %21 {strides = array<i32>} : memref<1x112xf32, #tpu.memory_space<vmem>>, vector<1x112xf32>,
    %c0_i32_14 = arith.constant 0 : i32
    %23 = arith.cmpi eq, %arg1, %c0_i32_14 : i32
    %24 = arith.extui %23 : i1 to i32
    %c0_i32_15 = arith.constant 0 : i32
    %25 = arith.cmpi ne, %24, %c0_i32_15 : i32
    scf.if %25 {
      %c0_16 = arith.constant 0 : index
      %c0_17 = arith.constant 0 : index
      %26 = vector.load %arg7[%c0_16, %c0_17] : memref<1x112xf32, #tpu.memory_space<vmem>>, vector<1x112xf32>
      %27 = vector.shape_cast %26 : vector<1x112xf32> to vector<1x1x112xf32>
      %cst_18 = arith.constant dense<0.000000e+00> : vector<1xf32>
      %28 = vector.multi_reduction <add>, %27, %cst_18 [1, 2] : vector<1x1x112xf32> to vector<1xf32>
      %29 = vector.shape_cast %28 : vector<1xf32> to vector<1x1x1xf32>
      %30 = vector.extract %29[0, 0, 0] : f32 from vector<1x1x1xf32>
      %cst_19 = arith.constant 0.000000e+00 : f32
      %31 = arith.subf %cst_19, %30 : f32
      %32 = vector.broadcast %31 : f32 to vector<1x8x128xf32>
      %c0_20 = arith.constant 0 : index
      %c0_21 = arith.constant 0 : index
      %c0_22 = arith.constant 0 : index
      %33 = vector.load %arg6[%c0_20, %c0_21, %c0_22] : memref<1x8x128xf32, #tpu.memory_space<vmem>>, vector<1x8x128xf32>
      tpu.vector_store %arg6[%c0_20, %c0_21, %c0_22], %32 {strides = array<i32>} : memref<1x8x128xf32, #tpu.memory_space<vmem>>, vector<1x8x128xf32>,
    } else {
    }
    return
  }
  func.func @transform_0(%arg0: i32, %arg1: i32) -> (i32, i32) {
    %c1_i32 = arith.constant 1 : i32
    %0 = arith.muli %arg0, %c1_i32 : i32
    %1 = arith.addi %0, %arg1 : i32
    %c0_i32 = arith.constant 0 : i32
    %2 = arith.minsi %1, %c0_i32 : i32
    %c0_i32_0 = arith.constant 0 : i32
    %c0_i32_1 = arith.constant 0 : i32
    return %2, %c0_i32_0 : i32, i32
  }
  func.func @transform_1(%arg0: i32, %arg1: i32) -> (i32, i32) {
    %c1_i32 = arith.constant 1 : i32
    %0 = arith.muli %arg0, %c1_i32 : i32
    %1 = arith.addi %0, %arg1 : i32
    %c0_i32 = arith.constant 0 : i32
    %c0_i32_0 = arith.constant 0 : i32
    return %1, %c0_i32 : i32, i32
  }
  func.func @transform_2(%arg0: i32, %arg1: i32) -> (i32, i32) {
    %c0_i32 = arith.constant 0 : i32
    %c0_i32_0 = arith.constant 0 : i32
    %c0_i32_1 = arith.constant 0 : i32
    return %c0_i32, %c0_i32_0 : i32, i32
  }
  func.func @transform_3(%arg0: i32, %arg1: i32) -> (i32, i32) {
    %c0_i32 = arith.constant 0 : i32
    %c0_i32_0 = arith.constant 0 : i32
    %c0_i32_1 = arith.constant 0 : i32
    return %c0_i32, %c0_i32_0 : i32, i32
  }
  func.func @transform_4(%arg0: i32, %arg1: i32) -> (i32, i32, i32) {
    %c0_i32 = arith.constant 0 : i32
    %c0_i32_0 = arith.constant 0 : i32
    %c0_i32_1 = arith.constant 0 : i32
    return %arg0, %c0_i32, %c0_i32_0 : i32, i32, i32
  }
}

</mosaic_0001>

<bundles_post_ra>
// kernel: tpu_custom_call.1
= control target key start
LH: loop header
LB: loop body
LE: loop exit
PB: predicated region body
PF: predicated region fallthrough
CT: control target
= control target key end

     0   :  { %9 = vsyncpa [#allocation4], 0  ;;  %s357_s0 = inlined_call_operand.hbm [shape: f32[1,112], index: 0, kind: input, shape index: {}]   ;;  %s358_s1 = inlined_call_operand.hbm [shape: bf16[8,16], index: 1, kind: input, shape index: {}]   ;;  %s359_s2 = inlined_call_operand.hbm [shape: bf16[16,112], index: 2, kind: input, shape index: {}]   ;;  %s360_s3 = inlined_call_operand.vmem [shape: f32[1,112], index: 3, kind: input, shape index: {}]   ;;  %s361_s4 = inlined_call_operand.hbm [shape: f32[1,8,128], index: 4, kind: output, shape index: {}]  }
   0x1   :  { %10 = vsyncpa [#allocation7], 0 }
   0x2   :  { %11 = vsyncpa [#allocation5], 0 }
   0x3   :  { %22 = vsyncadd [#allocation4], 112  ;;  %s304_s15 = smov [#allocation6]   ;;  %s305_s17 = smov [#allocation3]  }
   0x4   :  { %s42_s16 = sshll.u32 %s304_s15, 4  ;;  %s26_s18 = sshll.u32 %s305_s17, 4  ;;  %s43_s16 = int_to_ptr.vmem [resolvable:$true] %s42_s16  ;;  %s27_s18 = int_to_ptr.vmem [resolvable:$true] %s26_s18 }
   0x5   :  { %s226_s19 = scalar_lea.vmem %s43_s16, 64  ;;  %p231_p1 = scmp.lt.s32.totalorder %s43_s16, %s43_s16 }
   0x6   :  { %p227_p0 = scmp.ne.s32.totalorder %s43_s16, %s226_s19  ;;  %p232_p2 = scmp.lt.s32.totalorder %s226_s19, %s226_s19 }
   0x8   :  { %p233_p3 = por %p232_p2, %p231_p1 }
   0xa   :  { %p234_p4 = pnand %p233_p3, %p227_p0 }
   0xc   :  { %237 = shalt.err (!%p234_p4)
}
   0xd   :  { %45 = dma.hbm_to_vmem [thread:$0]  %s358_s1, 64, %s43_s16, [#allocation7]  }
   0xe   :  { %s246_s22 = scalar_lea.vmem %s27_s18, 16  ;;  %s250_s23 = scalar_lea.vmem %s27_s18, 128 }
   0xf   :  { %p247_p5 = scmp.ne.s32.totalorder %s27_s18, %s246_s22  ;;  %p251_p6 = scmp.lt.s32.totalorder %s27_s18, %s27_s18 }
  0x10   :  { %p252_p7 = scmp.lt.s32.totalorder %s250_s23, %s246_s22 }
  0x12   :  { %p253_p8 = por %p252_p7, %p251_p6 }
  0x14   :  { %p254_p9 = pnand %p253_p8, %p247_p5 }
  0x16   :  { %257 = shalt.err (!%p254_p9)
}
  0x17   :  { %s306_s24 = smov 16   ;;  %s307_s25 = smov 1  }
  0x18   :  { %32 = dma.hbm_to_vmem [thread:$0]  %s357_s0, 16, %s27_s18, [#allocation4], %s306_s24, %s306_s24, %s307_s25  }
  0x19   :  { %s308_s28 = smov [#allocation8]  }
  0x1a   :  { %s51_s29 = sshll.u32 %s308_s28, 4  ;;  %s52_s29 = int_to_ptr.vmem [resolvable:$true] %s51_s29 }
  0x1b   :  { %s266_s30 = scalar_lea.vmem %s52_s29, 128  ;;  %p271_p11 = scmp.lt.s32.totalorder %s52_s29, %s52_s29 }
  0x1c   :  { %p267_p10 = scmp.ne.s32.totalorder %s52_s29, %s266_s30  ;;  %p272_p12 = scmp.lt.s32.totalorder %s266_s30, %s266_s30 }
  0x1e   :  { %p273_p13 = por %p272_p12, %p271_p11 }
  0x20   :  { %p274_p0 = pnand %p273_p13, %p267_p10 }
  0x22   :  { %277 = shalt.err (!%p274_p0)
}
  0x23   :  { %s309_s1 = smov 64   ;;  %s310_s5 = smov 4  }
  0x24   :  { %57 = dma.hbm_to_vmem [thread:$0]  %s359_s2, 128, %s52_s29, [#allocation7], %s309_s1, %s309_s1, %s310_s5  }
  0x25   :  { %298 = dma.done.wait [#allocation4], 128  }
  0x26   :  { %299 = vsyncadd [#allocation4], 4294967168 }
  0x27   :  { %300 = dma.done.wait [#allocation7], 192  }
  0x28   :  { %301 = vsyncadd [#allocation7], 4294967104  ;;  %v311_v0 = vmov 0.0   ;;  %vm312_vm0 = vmmov 0   ;;  %v217_v1 = vld [vmem:[#allocation8] sm:$0xff]   ;;  %vm93_vm1 = vcmask 130048  }
  0x29   :  { %199 = vmatprep.subr.bf16.mxu0 %v311_v0  ;;  %201 = vmatprep.mubr.msk.bf16.mxu0 %vm312_vm0, %v311_v0  ;;  %v86_v2 = vld [vmem:[#allocation6] sm:$0xf]  ;;  %vm81_vm2 = vcmask 909312   ;;  %v196_v3 = vld [vmem:[%s360_s3] ss:$0 sm:$0xff]  ;;  %v144_v4 = vld [vmem:[#allocation3] sm:$0xff] }
  0x2a   :  { %200 = vmatpush3.bf16.msra.mxu0 %v217_v1  ;;  %82 = vst.msk [vmem:[#allocation2] sm:$0x1] %vm81_vm2, %v311_v0  ;;  %vm146_vm3 = vcmask 916480   ;;  %s313_s2 = smov [#allocation9]  }
  0x2b   :  { %s182_s3 = sshll.u32 %s313_s2, 4  ;;  %s183_s3 = int_to_ptr.vmem [resolvable:$true] %s182_s3 }
  0x2c   :  { %s278_s11 = scalar_lea.vmem %s183_s3, 128  ;;  %p283_p2 = scmp.lt.s32.totalorder %s183_s3, %s183_s3 }
  0x2d   :  { %202 = vmatmul.mubr.msk.bf16.vlgmr.msra.gmra.mxu0 %vm93_vm1, %v86_v2  ;;  %p279_p1 = scmp.ne.s32.totalorder %s183_s3, %s278_s11  ;;  %p284_p3 = scmp.lt.s32.totalorder %s278_s11, %s278_s11 }
  0x2f   :  { %p285_p4 = por %p284_p3, %p283_p2 }
  0x31   :  { %v155_v16 = vld [vmem:[#allocation2] sm:$0x1]  ;;  %p286_p5 = pnand %p285_p4, %p279_p1 }
  0xed   :  { %v131_v5 = vpop.f32.mrf.mxu0 }
  0xee   :  { %vm143_vm4 = vcmp.eq.f32.partialorder %v131_v5, %v196_v3 }
  0xef   :  { %v145_v6 = vsel %vm143_vm4, %v144_v4, 0.0  ;;  %v203_v7 = vpop.f32.mrf.mxu0 }
  0xf0   :  { %v147_v8 = vsel %vm146_vm3, %v145_v6, 0.0 }
  0xf1   :  { %v148_v9 = vrot.slane %v147_v8, 4  ;;  %v134_v10 = vpop.f32.mrf.mxu0 }
  0xf3   :  { %v149_v11 = vadd.f32 %v148_v9, %v147_v8  ;;  %v204_v12 = vpop.f32.mrf.mxu0 }
  0xf5   :  { %v150_v13 = vrot.slane %v149_v11, 2 }
  0xf7   :  { %v151_v14 = vadd.f32 %v150_v13, %v149_v11 }
  0xf9   :  { %v152_v15 = vrot.slane %v151_v14, 1 }
  0xfb   :  { %v153_v17 = vadd.f32 %v152_v15, %v151_v14 }
  0xfd   :  { %v156_v18 = vadd.f32 %v155_v16, %v153_v17 }
  0xff   :  { %158 = vst.msk [vmem:[#allocation2] sm:$0x1] %vm81_vm2, %v156_v18 }
 0x106   :  { %v162_v19 = vld [vmem:[#allocation2] sm:$0x1] }
 0x107   :  { %v163_v20 = vsel %vm81_vm2, %v162_v19, 0.0 }
 0x108   :  { %164 = vadd.xlane.f32.xlu0 %v163_v20 }
 0x191   :  { %v165_v21 = vpop.xlane.xlu0 %164 }
 0x192   :  { %v166_v22 = vrot.slane %v165_v21, 4 }
 0x194   :  { %v167_v23 = vadd.f32 %v166_v22, %v165_v21 }
 0x196   :  { %v168_v24 = vrot.slane %v167_v23, 2 }
 0x198   :  { %v169_v25 = vadd.f32 %v168_v24, %v167_v23 }
 0x19a   :  { %v170_v26 = vrot.slane %v169_v25, 1 }
 0x19c   :  { %v171_v27 = vadd.f32 %v170_v26, %v169_v25 }
 0x19e   :  { %205 = vpush %v171_v27 }
 0x1cf   :  { %s206_s9 = spop %205 }
 0x1d0   :  { %s173_s10 = ssub.f32 0.0, %s206_s9 }
 0x1d2   :  { %v174_v28 = vstv %s173_s10 }
 0x1d3   :  { %175 = vst [vmem:[#allocation9] sm:$0xff] %v174_v28 }
 0x1d4   :  { %289 = shalt.err (!%p286_p5)
}
 0x1d5   :  { %185 = dma.vmem_to_hbm [thread:$0]  %s183_s3, 128, %s361_s4, [#allocation5]  }
 0x1d6   :  { %302 = dma.done.wait [#allocation5], 128  }
 0x1d7   :  { %303 = vsyncadd [#allocation5], 4294967168 }
 0x1d8   :  { %189 = vsyncpa [#allocation4], 1 }
 0x1d9   :  { %190 = vsyncpa [#allocation7], 1 }
 0x1da   :  { %191 = vsyncpa [#allocation5], 1 }

</bundles_post_ra>
